<compile_context>
chip_gen: v7x
topology: tpu7x:2x2x1
jax: 0.10.0
libtpu: 0.0.40
codegen_flags: <defaults>
</compile_context>

<pallas_src>
import math
from functools import partial

import jax
import jax.numpy as jnp
from jax.experimental import pallas as pl
from jax.experimental.pallas import tpu as pltpu

_INV_SQRT2 = 1.0 / math.sqrt(2.0)
_TANH_GELU_C = math.sqrt(2.0 / math.pi)


def _round_up(x, m):
    return ((x + m - 1) // m) * m


def _cdiv(a, b):
    return -(-a // b)


def _vmem_capacity_bytes():
    """Physical VMEM per TensorCore; conservative fallback if the query fails."""
    try:
        return int(pltpu.get_tpu_info().vmem_capacity_bytes)
    except Exception:
        return 64 << 20  # v7x per-TC capacity == most restrictive generation


def _intermediate_kernel(x_ref, w_ref, b_ref, o_ref, *, compute_dtype,
                         use_tanh_gelu):
    # Cast the row tile to the MXU-native operand dtype inside the kernel so
    # the wrapper does not need a separate full-HBM astype pass over x.
    x = x_ref[...].astype(compute_dtype)
    acc = jnp.dot(x, w_ref[...], preferred_element_type=jnp.float32)
    acc = acc + b_ref[...].astype(jnp.float32)
    if use_tanh_gelu:
        # tanh lowers to the EUP (separate VLIW slot), relieving the VALU-bound
        # exact-erf epilogue on v6e/v7x.  Off by default (accuracy sign-off).
        g = 0.5 * acc * (1.0 + jnp.tanh(
            _TANH_GELU_C * (acc + 0.044715 * acc * acc * acc)))
    else:
        # Exact GELU (nn.GELU default): 0.5 * z * (1 + erf(z / sqrt(2))) in f32.
        g = 0.5 * acc * (1.0 + jax.lax.erf(acc * _INV_SQRT2))
    o_ref[...] = g.astype(o_ref.dtype)


def bert_intermediate(x, w, b, *, tm=None, compute_dtype=jnp.bfloat16,
                      out_dtype=jnp.bfloat16, use_tanh_gelu=False):
    """y = GELU(x @ w + b).   x: [M, H], w: [H, I], b: [I]  ->  [M, I].

    1-D grid over row tiles of x; the (H, I) weight + bias stay VMEM-resident.
    For strict PyTorch f32 parity pass compute_dtype=out_dtype=jnp.float32.
    """
    M, H = x.shape
    Hw, I = w.shape
    assert H == Hw and b.shape == (I,)
    assert I % 128 == 0, "intermediate size must be a multiple of 128 (lanes)"

    cb = jnp.dtype(compute_dtype).itemsize
    ob = jnp.dtype(out_dtype).itemsize
    xb = x.dtype.itemsize

    vmem_cap = _vmem_capacity_bytes()
    budget = vmem_cap - (8 << 20)  # headroom for compiler-internal scratch

    def footprint(tm_, w_buffers=1):
        return (2 * tm_ * H * xb          # x row tile, double-buffered, native dtype
                + w_buffers * H * I * cb  # resident weight
                + w_buffers * 8 * I * 4   # resident bias (sublane-padded, f32)
                + 2 * tm_ * I * ob        # output tile, double-buffered
                + 2 * tm_ * I * 4)        # f32 accumulator + GELU temporaries

    # TODO(synk): if H*I ever outgrows the VMEM budget (huge intermediate
    # sizes), tile the I dimension with a 2-D grid instead of a resident weight.

    # Balanced, VMEM-aware row tiling: smallest tile count nt such that the
    # ceil(M/nt) tile (sublane-aligned) fits the budget => no ~2x padding blow-up.
    tm_cap = tm if tm is not None else (1024 if vmem_cap > (96 << 20) else 256)
    M8 = _round_up(M, 8)
    nt = max(1, _cdiv(M8, max(8, tm_cap)))
    while True:
        tm_ = _round_up(_cdiv(M8, nt), 8)
        if footprint(tm_) + (4 << 20) <= budget or tm_ <= 8:
            break
        nt += 1
    tm = tm_
    M_pad = tm * nt

    if M_pad != M:
        # Padded rows produce GELU(b) garbage; they are sliced off below.
        x = jnp.pad(x, ((0, M_pad - M), (0, 0)))

    w = w.astype(compute_dtype)               # one-time cast; weight DMA'd once
    b2d = b.reshape(1, I).astype(jnp.float32)  # keep bias 2-D / lane-major

    kernel = partial(_intermediate_kernel, compute_dtype=compute_dtype,
                     use_tanh_gelu=use_tanh_gelu)

    def call(single_buffer_resident):
        if single_buffer_resident:
            w_buffers = 1
            w_spec = pl.BlockSpec((H, I), lambda i: (0, 0),
                                  pipeline_mode=pl.Buffered(1))
            b_spec = pl.BlockSpec((1, I), lambda i: (0, 0),
                                  pipeline_mode=pl.Buffered(1))
        else:
            w_buffers = 2
            w_spec = pl.BlockSpec((H, I), lambda i: (0, 0))
            b_spec = pl.BlockSpec((1, I), lambda i: (0, 0))
        vmem_limit = int(min(budget,
                             max(footprint(tm, w_buffers) + (8 << 20),
                                 32 << 20)))
        return pl.pallas_call(
            kernel,
            out_shape=jax.ShapeDtypeStruct((M_pad, I), out_dtype),
            grid_spec=pltpu.PrefetchScalarGridSpec(
                num_scalar_prefetch=0,
                grid=(M_pad // tm,),
                in_specs=[
                    pl.BlockSpec((tm, H), lambda i: (i, 0)),  # x row tile (full K)
                    w_spec,                                   # weight: VMEM-resident
                    b_spec,                                   # bias: VMEM-resident
                ],
                out_specs=pl.BlockSpec((tm, I), lambda i: (i, 0)),
            ),
            compiler_params=pltpu.CompilerParams(
                dimension_semantics=("parallel",),
                vmem_limit_bytes=vmem_limit,
            ),
        )(x, w, b2d)

    try:
        y = call(single_buffer_resident=True)
    except Exception:
        # Fallback if pipeline_mode=pl.Buffered(1) is unsupported here; costs
        # one extra resident weight copy in VMEM but remains correct.
        y = call(single_buffer_resident=False)

    return y[:M] if M_pad != M else y


def standard_bert_intermediate(hidden_states, w, b, *, tm=None,
                               compute_dtype=jnp.bfloat16,
                               out_dtype=jnp.bfloat16, use_tanh_gelu=False):
    """hidden_states: [B, S, H] -> [B, S, I] (matches the PyTorch module)."""
    B, S, H = hidden_states.shape
    I = w.shape[1]
    x2d = hidden_states.reshape(B * S, H)
    y2d = bert_intermediate(x2d, w, b, tm=tm, compute_dtype=compute_dtype,
                            out_dtype=out_dtype, use_tanh_gelu=use_tanh_gelu)
    return y2d.reshape(B, S, I)


if __name__ == "__main__":
    # Small, BERT-like shapes: batch=2, seq=8, hidden=32, intermediate=128.
    B, S, H, I = 2, 8, 32, 128

    key = jax.random.PRNGKey(0)
    kx, kw, kb = jax.random.split(key, 3)

    hidden_states = jax.random.normal(kx, (B, S, H), dtype=jnp.float32)
    # nn.Linear weight is [I, H]; the kernel consumes the transpose [H, I].
    w = jax.random.normal(kw, (H, I), dtype=jnp.float32) * (1.0 / math.sqrt(H))
    b = jax.random.normal(kb, (I,), dtype=jnp.float32) * 0.02

    # Default (performance) path: bf16 MXU operands, f32 accumulate, bf16 out.
    out = standard_bert_intermediate(hidden_states, w, b)
    out = jax.block_until_ready(out)

    # Pure-JAX reference with the same dtype policy (bf16 operands, f32
    # accumulation, f32 bias add + exact-erf GELU, bf16 store).
    x2d = hidden_states.reshape(B * S, H)
    acc = jnp.dot(x2d.astype(jnp.bfloat16), w.astype(jnp.bfloat16),
                  preferred_element_type=jnp.float32) + b
    ref = (0.5 * acc * (1.0 + jax.lax.erf(acc * _INV_SQRT2)))
    ref = ref.astype(jnp.bfloat16).reshape(B, S, I)

    assert out.shape == (B, S, I)
    assert out.dtype == jnp.bfloat16
    assert jnp.allclose(out.astype(jnp.float32), ref.astype(jnp.float32),
                        atol=2e-2, rtol=2e-2)

    print("KERNEL_OK")
</pallas_src>

<mosaic_0001>
module attributes {stable_mosaic.version = 11 : i64} {
  func.func @_intermediate_kernel(%arg0: i32, %arg1: memref<16x32xf32, #tpu.memory_space<vmem>>, %arg2: memref<32x128xbf16, #tpu.memory_space<vmem>>, %arg3: memref<1x128xf32, #tpu.memory_space<vmem>>, %arg4: memref<16x128xbf16, #tpu.memory_space<vmem>>) attributes {dimension_semantics = [#tpu.dimension_semantics<parallel>], iteration_bounds = array<i64: 1>, scalar_prefetch = 0 : i64, scratch_operands = 0 : i64, tpu.core_type = #tpu.core_type<tc>, window_params = [{transform_indices = @transform_0, window_bounds = array<i64: 16, 32>}, {pipeline_mode = #tpu.pipeline_mode<synchronous>, transform_indices = @transform_1, window_bounds = array<i64: 32, 128>}, {pipeline_mode = #tpu.pipeline_mode<synchronous>, transform_indices = @transform_2, window_bounds = array<i64: 1, 128>}, {transform_indices = @transform_3, window_bounds = array<i64: 16, 128>}]} {
    %c0 = arith.constant 0 : index
    %c0_0 = arith.constant 0 : index
    %0 = vector.load %arg1[%c0, %c0_0] : memref<16x32xf32, #tpu.memory_space<vmem>>, vector<16x32xf32>
    %1 = arith.truncf %0 : vector<16x32xf32> to vector<16x32xbf16>
    %c0_1 = arith.constant 0 : index
    %c0_2 = arith.constant 0 : index
    %2 = vector.load %arg2[%c0_1, %c0_2] : memref<32x128xbf16, #tpu.memory_space<vmem>>, vector<32x128xbf16>
    %cst = arith.constant dense<0.000000e+00> : vector<16x128xf32>
    %3 = tpu.matmul %1, %2, %cst {dimension_numbers = #tpu.dot_dimension_numbers<[1], [0], [0], [1], [0, 0, 1, 1], [], []>} : vector<16x32xbf16>, vector<32x128xbf16>, vector<16x128xf32> -> vector<16x128xf32>
    %c0_3 = arith.constant 0 : index
    %c0_4 = arith.constant 0 : index
    %4 = vector.load %arg3[%c0_3, %c0_4] : memref<1x128xf32, #tpu.memory_space<vmem>>, vector<1x128xf32>
    %5 = vector.broadcast %4 : vector<1x128xf32> to vector<16x128xf32>
    %6 = arith.addf %3, %5 : vector<16x128xf32>
    %cst_5 = arith.constant 5.000000e-01 : f32
    %7 = vector.broadcast %cst_5 : f32 to vector<16x128xf32>
    %8 = arith.mulf %7, %6 : vector<16x128xf32>
    %cst_6 = arith.constant 0.707106769 : f32
    %9 = vector.broadcast %cst_6 : f32 to vector<16x128xf32>
    %10 = arith.mulf %6, %9 : vector<16x128xf32>
    %11 = math.erf %10 : vector<16x128xf32>
    %cst_7 = arith.constant 1.000000e+00 : f32
    %12 = vector.broadcast %cst_7 : f32 to vector<16x128xf32>
    %13 = arith.addf %12, %11 : vector<16x128xf32>
    %14 = arith.mulf %8, %13 : vector<16x128xf32>
    %15 = arith.truncf %14 : vector<16x128xf32> to vector<16x128xbf16>
    %c0_8 = arith.constant 0 : index
    %c0_9 = arith.constant 0 : index
    %16 = vector.load %arg4[%c0_8, %c0_9] : memref<16x128xbf16, #tpu.memory_space<vmem>>, vector<16x128xbf16>
    tpu.vector_store %arg4[%c0_8, %c0_9], %15 {strides = array<i32>} : memref<16x128xbf16, #tpu.memory_space<vmem>>, vector<16x128xbf16>,
    return
  }
  func.func @transform_0(%arg0: i32) -> (i32, i32) {
    %c0_i32 = arith.constant 0 : i32
    %c0_i32_0 = arith.constant 0 : i32
    return %arg0, %c0_i32 : i32, i32
  }
  func.func @transform_1(%arg0: i32) -> (i32, i32) {
    %c0_i32 = arith.constant 0 : i32
    %c0_i32_0 = arith.constant 0 : i32
    %c0_i32_1 = arith.constant 0 : i32
    return %c0_i32, %c0_i32_0 : i32, i32
  }
  func.func @transform_2(%arg0: i32) -> (i32, i32) {
    %c0_i32 = arith.constant 0 : i32
    %c0_i32_0 = arith.constant 0 : i32
    %c0_i32_1 = arith.constant 0 : i32
    return %c0_i32, %c0_i32_0 : i32, i32
  }
  func.func @transform_3(%arg0: i32) -> (i32, i32) {
    %c0_i32 = arith.constant 0 : i32
    %c0_i32_0 = arith.constant 0 : i32
    return %arg0, %c0_i32 : i32, i32
  }
}

module attributes {stable_mosaic.version = 11 : i64} {
  func.func @_intermediate_kernel(%arg0: i32, %arg1: memref<16x32xf32, #tpu.memory_space<vmem>>, %arg2: memref<32x128xbf16, #tpu.memory_space<vmem>>, %arg3: memref<1x128xf32, #tpu.memory_space<vmem>>, %arg4: memref<16x128xbf16, #tpu.memory_space<vmem>>) attributes {dimension_semantics = [#tpu.dimension_semantics<parallel>], iteration_bounds = array<i64: 1>, scalar_prefetch = 0 : i64, scratch_operands = 0 : i64, tpu.core_type = #tpu.core_type<tc>, window_params = [{transform_indices = @transform_0, window_bounds = array<i64: 16, 32>}, {pipeline_mode = #tpu.pipeline_mode<synchronous>, transform_indices = @transform_1, window_bounds = array<i64: 32, 128>}, {pipeline_mode = #tpu.pipeline_mode<synchronous>, transform_indices = @transform_2, window_bounds = array<i64: 1, 128>}, {transform_indices = @transform_3, window_bounds = array<i64: 16, 128>}]} {
    %c0 = arith.constant 0 : index
    %c0_0 = arith.constant 0 : index
    %0 = vector.load %arg1[%c0, %c0_0] : memref<16x32xf32, #tpu.memory_space<vmem>>, vector<16x32xf32>
    %1 = arith.truncf %0 : vector<16x32xf32> to vector<16x32xbf16>
    %c0_1 = arith.constant 0 : index
    %c0_2 = arith.constant 0 : index
    %2 = vector.load %arg2[%c0_1, %c0_2] : memref<32x128xbf16, #tpu.memory_space<vmem>>, vector<32x128xbf16>
    %cst = arith.constant dense<0.000000e+00> : vector<16x128xf32>
    %3 = tpu.matmul %1, %2, %cst {dimension_numbers = #tpu.dot_dimension_numbers<[1], [0], [0], [1], [0, 0, 1, 1], [], []>} : vector<16x32xbf16>, vector<32x128xbf16>, vector<16x128xf32> -> vector<16x128xf32>
    %c0_3 = arith.constant 0 : index
    %c0_4 = arith.constant 0 : index
    %4 = vector.load %arg3[%c0_3, %c0_4] : memref<1x128xf32, #tpu.memory_space<vmem>>, vector<1x128xf32>
    %5 = vector.broadcast %4 : vector<1x128xf32> to vector<16x128xf32>
    %6 = arith.addf %3, %5 : vector<16x128xf32>
    %cst_5 = arith.constant 5.000000e-01 : f32
    %7 = vector.broadcast %cst_5 : f32 to vector<16x128xf32>
    %8 = arith.mulf %7, %6 : vector<16x128xf32>
    %cst_6 = arith.constant 0.707106769 : f32
    %9 = vector.broadcast %cst_6 : f32 to vector<16x128xf32>
    %10 = arith.mulf %6, %9 : vector<16x128xf32>
    %11 = math.erf %10 : vector<16x128xf32>
    %cst_7 = arith.constant 1.000000e+00 : f32
    %12 = vector.broadcast %cst_7 : f32 to vector<16x128xf32>
    %13 = arith.addf %12, %11 : vector<16x128xf32>
    %14 = arith.mulf %8, %13 : vector<16x128xf32>
    %15 = arith.truncf %14 : vector<16x128xf32> to vector<16x128xbf16>
    %c0_8 = arith.constant 0 : index
    %c0_9 = arith.constant 0 : index
    %16 = vector.load %arg4[%c0_8, %c0_9] : memref<16x128xbf16, #tpu.memory_space<vmem>>, vector<16x128xbf16>
    tpu.vector_store %arg4[%c0_8, %c0_9], %15 {strides = array<i32>} : memref<16x128xbf16, #tpu.memory_space<vmem>>, vector<16x128xbf16>,
    return
  }
  func.func @transform_0(%arg0: i32) -> (i32, i32) {
    %c0_i32 = arith.constant 0 : i32
    %c0_i32_0 = arith.constant 0 : i32
    return %arg0, %c0_i32 : i32, i32
  }
  func.func @transform_1(%arg0: i32) -> (i32, i32) {
    %c0_i32 = arith.constant 0 : i32
    %c0_i32_0 = arith.constant 0 : i32
    %c0_i32_1 = arith.constant 0 : i32
    return %c0_i32, %c0_i32_0 : i32, i32
  }
  func.func @transform_2(%arg0: i32) -> (i32, i32) {
    %c0_i32 = arith.constant 0 : i32
    %c0_i32_0 = arith.constant 0 : i32
    %c0_i32_1 = arith.constant 0 : i32
    return %c0_i32, %c0_i32_0 : i32, i32
  }
  func.func @transform_3(%arg0: i32) -> (i32, i32) {
    %c0_i32 = arith.constant 0 : i32
    %c0_i32_0 = arith.constant 0 : i32
    return %arg0, %c0_i32 : i32, i32
  }
}

</mosaic_0001>

<bundles_post_ra>
// kernel: tpu_custom_call.1
= control target key start
LH: loop header
LB: loop body
LE: loop exit
PB: predicated region body
PF: predicated region fallthrough
CT: control target
= control target key end

     0   :  { %8 = vsyncpa [#allocation3], 0  ;;  %s338_s0 = inlined_call_operand.hbm [shape: f32[16,32], index: 0, kind: input, shape index: {}]   ;;  %s339_s1 = inlined_call_operand.hbm [shape: bf16[32,128], index: 1, kind: input, shape index: {}]   ;;  %s340_s2 = inlined_call_operand.vmem [shape: f32[1,128], index: 2, kind: input, shape index: {}]   ;;  %s341_s3 = inlined_call_operand.hbm [shape: bf16[16,128], index: 3, kind: output, shape index: {}]  }
   0x1   :  { %9 = vsyncpa [#allocation6], 0 }
   0x2   :  { %10 = vsyncpa [#allocation4], 0  ;;  %s264_s12 = smov [#allocation2]   ;;  %s192_s16 = scalar_lea.hbm %s338_s0, 256 }
   0x3   :  { %s16_s13 = sshll.u32 %s264_s12, 4  ;;  %p193_p0 = scmp.ne.s32.totalorder %s338_s0, %s192_s16  ;;  %s17_s13 = int_to_ptr.vmem [resolvable:$true] %s16_s13 }
   0x4   :  { %p196_p1 = scmp.lt.u32.totalorder %s192_s16, %s338_s0 }
   0x6   :  { %p198_p2 = pnand %p196_p1, %p193_p0 }
   0x8   :  { %201 = shalt.err (!%p198_p2)
}
   0x9   :  { %s202_s21 = scalar_lea.vmem %s17_s13, 256  ;;  %p207_p4 = scmp.lt.s32.totalorder %s17_s13, %s17_s13 }
   0xa   :  { %p203_p3 = scmp.ne.s32.totalorder %s17_s13, %s202_s21  ;;  %p208_p5 = scmp.lt.s32.totalorder %s202_s21, %s202_s21 }
   0xc   :  { %p209_p6 = por %p208_p5, %p207_p4 }
   0xe   :  { %p210_p7 = pnand %p209_p6, %p203_p3 }
  0x10   :  { %213 = shalt.err (!%p210_p7)
}
  0x11   :  { %s265_s22 = smov 128   ;;  %s266_s23 = smov 8  }
  0x12   :  { %22 = dma.hbm_to_vmem [thread:$0]  %s338_s0, 256, %s17_s13, [#allocation3], %s265_s22, %s265_s22, %s266_s23  }
  0x13   :  { %s267_s26 = smov [#allocation5]   ;;  %s214_s30 = scalar_lea.hbm %s339_s1, 256 }
  0x14   :  { %s28_s27 = sshll.u32 %s267_s26, 4  ;;  %p215_p8 = scmp.ne.s32.totalorder %s339_s1, %s214_s30  ;;  %s29_s27 = int_to_ptr.vmem [resolvable:$true] %s28_s27 }
  0x15   :  { %p218_p9 = scmp.lt.u32.totalorder %s214_s30, %s339_s1 }
  0x17   :  { %p220_p10 = pnand %p218_p9, %p215_p8 }
  0x19   :  { %223 = shalt.err (!%p220_p10)
}
  0x1a   :  { %s224_s8 = scalar_lea.vmem %s29_s27, 256  ;;  %p229_p12 = scmp.lt.s32.totalorder %s29_s27, %s29_s27 }
  0x1b   :  { %p225_p11 = scmp.ne.s32.totalorder %s29_s27, %s224_s8  ;;  %p230_p13 = scmp.lt.s32.totalorder %s224_s8, %s224_s8 }
  0x1d   :  { %p231_p0 = por %p230_p13, %p229_p12 }
  0x1f   :  { %p232_p1 = pnand %p231_p0, %p225_p11 }
  0x21   :  { %235 = shalt.err (!%p232_p1)
}
  0x22   :  { %s268_s0 = smov 64   ;;  %s269_s9 = smov 4  }
  0x23   :  { %34 = dma.hbm_to_vmem [thread:$0]  %s339_s1, 256, %s29_s27, [#allocation6], %s268_s0, %s268_s0, %s269_s9  }
  0x24   :  { %258 = dma.done.wait [#allocation3], 256  }
  0x25   :  { %259 = vsyncadd [#allocation3], 4294967040 }
  0x26   :  { %260 = dma.done.wait [#allocation6], 256  }
  0x27   :  { %261 = vsyncadd [#allocation6], 4294967040  ;;  %v270_v0 = vmov 0.0   ;;  %vm271_vm0 = vmmov 0   ;;  %v186_v1 = vld [vmem:[#allocation5] sm:$0xff]   ;;  %v187_v2 = vld [vmem:[#allocation5 + $0x8] sm:$0xff]  }
  0x28   :  { %169 = vmatprep.subr.bf16.mxu0 %v270_v0  ;;  %173 = vmatprep.mubr.msk.bf16.mxu0 %vm271_vm0, %v270_v0  ;;  %v44_v3 = vld [vmem:[#allocation2] sm:$0xff]  ;;  %v45_v4 = vld [vmem:[#allocation2 + $0x8] sm:$0xff]  ;;  %vm70_vm1 = vcmask 261120   ;;  %s272_s13 = smov [#allocation7]  }
  0x29   :  { %170 = vmatpush3.bf16.msra.mxu0 %v186_v1  ;;  %v46_v5 = vpack.c.bf16 %v45_v4, %v44_v3  ;;  %v153_v6 = vld [vmem:[%s340_s2] ss:$0 sm:$0xff]  ;;  %s140_s14 = sshll.u32 %s272_s13, 4  ;;  %s141_s14 = int_to_ptr.vmem [resolvable:$true] %s140_s14 }
  0x2a   :  { %171 = vmatprep.subr.bf16.mxu0 %v270_v0  ;;  %s236_s2 = scalar_lea.vmem %s141_s14, 128  ;;  %p241_p3 = scmp.lt.s32.totalorder %s141_s14, %s141_s14 }
  0x2b   :  { %p237_p2 = scmp.ne.s32.totalorder %s141_s14, %s236_s2  ;;  %p242_p4 = scmp.lt.s32.totalorder %s236_s2, %s236_s2 }
  0x2d   :  { %172 = vmatpush3.bf16.msra.mxu0 %v187_v2  ;;  %p243_p5 = por %p242_p4, %p241_p3 }
  0x2f   :  { %p244_p6 = pnand %p243_p5, %p237_p2 }
  0x30   :  { %174 = vmatmul.mubr.msk.bf16.vlgmr.msra.gmra.mrb[0].mxu0 %vm70_vm1, %v46_v5 }
 0x103   :  { %v108_v7 = vpop.f32.mrb[0].mxu0 }
 0x104   :  { %v109_v8 = vadd.f32 %v153_v6, %v108_v7  ;;  %v175_v9 = vpop.f32.mrb[1].mxu0 }
 0x105   :  { %v111_v10 = vpop.f32.mrb[2].mxu0 }
 0x106   :  { %v117_v11 = vmul.f32 0.70710677, %v109_v8  ;;  %v112_v12 = vadd.f32 %v153_v6, %v111_v10  ;;  %v176_v13 = vpop.f32.mrb[3].mxu0  ;;  %v115_v18 = vmul.f32 0.5, %v109_v8 }
 0x108   :  { %188 = verf.f32 %v117_v11  ;;  %v118_v14 = vmul.f32 0.70710677, %v112_v12  ;;  %v116_v19 = vmul.f32 0.5, %v112_v12 }
 0x10a   :  { %190 = verf.f32 %v118_v14 }
 0x112   :  { %v189_v15 = vpop.eup %188 }
 0x113   :  { %v121_v16 = vadd.f32 1.0, %v189_v15 }
 0x114   :  { %v191_v17 = vpop.eup %190 }
 0x115   :  { %v122_v20 = vadd.f32 1.0, %v191_v17  ;;  %v123_v21 = vmul.f32 %v121_v16, %v115_v18 }
 0x117   :  { %v124_v22 = vmul.f32 %v122_v20, %v116_v19 }
 0x119   :  { %v164_v23 = vpack.c.bf16 %v124_v22, %v123_v21 }
 0x11b   :  { %165 = vst [vmem:[#allocation7] sm:$0xff] %v164_v23  }
 0x11c   :  { %247 = shalt.err (!%p244_p6)
}
 0x11d   :  { %s248_s17 = scalar_lea.hbm %s341_s3, 128 }
 0x11e   :  { %p249_p7 = scmp.ne.s32.totalorder %s341_s3, %s248_s17  ;;  %p252_p8 = scmp.lt.u32.totalorder %s248_s17, %s341_s3 }
 0x120   :  { %p254_p9 = pnand %p252_p8, %p249_p7 }
 0x122   :  { %257 = shalt.err (!%p254_p9)
}
 0x123   :  { %146 = dma.vmem_to_hbm [thread:$0]  %s141_s14, 128, %s341_s3, [#allocation4], %s268_s0, %s268_s0, %s269_s9  }
 0x124   :  { %262 = dma.done.wait [#allocation4], 128  }
 0x125   :  { %263 = vsyncadd [#allocation4], 4294967168 }
 0x126   :  { %150 = vsyncpa [#allocation3], 1 }
 0x127   :  { %151 = vsyncpa [#allocation6], 1 }
 0x128   :  { %152 = vsyncpa [#allocation4], 1 }

// kernel: tpu_custom_call.1
= control target key start
LH: loop header
LB: loop body
LE: loop exit
PB: predicated region body
PF: predicated region fallthrough
CT: control target
= control target key end

     0   :  { %8 = vsyncpa [#allocation3], 0  ;;  %s338_s0 = inlined_call_operand.hbm [shape: f32[16,32], index: 0, kind: input, shape index: {}]   ;;  %s339_s1 = inlined_call_operand.hbm [shape: bf16[32,128], index: 1, kind: input, shape index: {}]   ;;  %s340_s2 = inlined_call_operand.vmem [shape: f32[1,128], index: 2, kind: input, shape index: {}]   ;;  %s341_s3 = inlined_call_operand.hbm [shape: bf16[16,128], index: 3, kind: output, shape index: {}]  }
   0x1   :  { %9 = vsyncpa [#allocation6], 0 }
   0x2   :  { %10 = vsyncpa [#allocation4], 0  ;;  %s264_s12 = smov [#allocation2]   ;;  %s192_s16 = scalar_lea.hbm %s338_s0, 256 }
   0x3   :  { %s16_s13 = sshll.u32 %s264_s12, 4  ;;  %p193_p0 = scmp.ne.s32.totalorder %s338_s0, %s192_s16  ;;  %s17_s13 = int_to_ptr.vmem [resolvable:$true] %s16_s13 }
   0x4   :  { %p196_p1 = scmp.lt.u32.totalorder %s192_s16, %s338_s0 }
   0x6   :  { %p198_p2 = pnand %p196_p1, %p193_p0 }
   0x8   :  { %201 = shalt.err (!%p198_p2)
}
   0x9   :  { %s202_s21 = scalar_lea.vmem %s17_s13, 256  ;;  %p207_p4 = scmp.lt.s32.totalorder %s17_s13, %s17_s13 }
   0xa   :  { %p203_p3 = scmp.ne.s32.totalorder %s17_s13, %s202_s21  ;;  %p208_p5 = scmp.lt.s32.totalorder %s202_s21, %s202_s21 }
   0xc   :  { %p209_p6 = por %p208_p5, %p207_p4 }
   0xe   :  { %p210_p7 = pnand %p209_p6, %p203_p3 }
  0x10   :  { %213 = shalt.err (!%p210_p7)
}
  0x11   :  { %s265_s22 = smov 128   ;;  %s266_s23 = smov 8  }
  0x12   :  { %22 = dma.hbm_to_vmem [thread:$0]  %s338_s0, 256, %s17_s13, [#allocation3], %s265_s22, %s265_s22, %s266_s23  }
  0x13   :  { %s267_s26 = smov [#allocation5]   ;;  %s214_s30 = scalar_lea.hbm %s339_s1, 256 }
  0x14   :  { %s28_s27 = sshll.u32 %s267_s26, 4  ;;  %p215_p8 = scmp.ne.s32.totalorder %s339_s1, %s214_s30  ;;  %s29_s27 = int_to_ptr.vmem [resolvable:$true] %s28_s27 }
  0x15   :  { %p218_p9 = scmp.lt.u32.totalorder %s214_s30, %s339_s1 }
  0x17   :  { %p220_p10 = pnand %p218_p9, %p215_p8 }
  0x19   :  { %223 = shalt.err (!%p220_p10)
}
  0x1a   :  { %s224_s8 = scalar_lea.vmem %s29_s27, 256  ;;  %p229_p12 = scmp.lt.s32.totalorder %s29_s27, %s29_s27 }
  0x1b   :  { %p225_p11 = scmp.ne.s32.totalorder %s29_s27, %s224_s8  ;;  %p230_p13 = scmp.lt.s32.totalorder %s224_s8, %s224_s8 }
  0x1d   :  { %p231_p0 = por %p230_p13, %p229_p12 }
  0x1f   :  { %p232_p1 = pnand %p231_p0, %p225_p11 }
  0x21   :  { %235 = shalt.err (!%p232_p1)
}
  0x22   :  { %s268_s0 = smov 64   ;;  %s269_s9 = smov 4  }
  0x23   :  { %34 = dma.hbm_to_vmem [thread:$0]  %s339_s1, 256, %s29_s27, [#allocation6], %s268_s0, %s268_s0, %s269_s9  }
  0x24   :  { %258 = dma.done.wait [#allocation3], 256  }
  0x25   :  { %259 = vsyncadd [#allocation3], 4294967040 }
  0x26   :  { %260 = dma.done.wait [#allocation6], 256  }
  0x27   :  { %261 = vsyncadd [#allocation6], 4294967040  ;;  %v270_v0 = vmov 0.0   ;;  %vm271_vm0 = vmmov 0   ;;  %v186_v1 = vld [vmem:[#allocation5] sm:$0xff]   ;;  %v187_v2 = vld [vmem:[#allocation5 + $0x8] sm:$0xff]  }
  0x28   :  { %169 = vmatprep.subr.bf16.mxu0 %v270_v0  ;;  %173 = vmatprep.mubr.msk.bf16.mxu0 %vm271_vm0, %v270_v0  ;;  %v44_v3 = vld [vmem:[#allocation2] sm:$0xff]  ;;  %v45_v4 = vld [vmem:[#allocation2 + $0x8] sm:$0xff]  ;;  %vm70_vm1 = vcmask 261120   ;;  %s272_s13 = smov [#allocation7]  }
  0x29   :  { %170 = vmatpush3.bf16.msra.mxu0 %v186_v1  ;;  %v46_v5 = vpack.c.bf16 %v45_v4, %v44_v3  ;;  %v153_v6 = vld [vmem:[%s340_s2] ss:$0 sm:$0xff]  ;;  %s140_s14 = sshll.u32 %s272_s13, 4  ;;  %s141_s14 = int_to_ptr.vmem [resolvable:$true] %s140_s14 }
  0x2a   :  { %171 = vmatprep.subr.bf16.mxu0 %v270_v0  ;;  %s236_s2 = scalar_lea.vmem %s141_s14, 128  ;;  %p241_p3 = scmp.lt.s32.totalorder %s141_s14, %s141_s14 }
  0x2b   :  { %p237_p2 = scmp.ne.s32.totalorder %s141_s14, %s236_s2  ;;  %p242_p4 = scmp.lt.s32.totalorder %s236_s2, %s236_s2 }
  0x2d   :  { %172 = vmatpush3.bf16.msra.mxu0 %v187_v2  ;;  %p243_p5 = por %p242_p4, %p241_p3 }
  0x2f   :  { %p244_p6 = pnand %p243_p5, %p237_p2 }
  0x30   :  { %174 = vmatmul.mubr.msk.bf16.vlgmr.msra.gmra.mrb[0].mxu0 %vm70_vm1, %v46_v5 }
 0x103   :  { %v108_v7 = vpop.f32.mrb[0].mxu0 }
 0x104   :  { %v109_v8 = vadd.f32 %v153_v6, %v108_v7  ;;  %v175_v9 = vpop.f32.mrb[1].mxu0 }
 0x105   :  { %v111_v10 = vpop.f32.mrb[2].mxu0 }
 0x106   :  { %v117_v11 = vmul.f32 0.70710677, %v109_v8  ;;  %v112_v12 = vadd.f32 %v153_v6, %v111_v10  ;;  %v176_v13 = vpop.f32.mrb[3].mxu0  ;;  %v115_v18 = vmul.f32 0.5, %v109_v8 }
 0x108   :  { %188 = verf.f32 %v117_v11  ;;  %v118_v14 = vmul.f32 0.70710677, %v112_v12  ;;  %v116_v19 = vmul.f32 0.5, %v112_v12 }
 0x10a   :  { %190 = verf.f32 %v118_v14 }
 0x112   :  { %v189_v15 = vpop.eup %188 }
 0x113   :  { %v121_v16 = vadd.f32 1.0, %v189_v15 }
 0x114   :  { %v191_v17 = vpop.eup %190 }
 0x115   :  { %v122_v20 = vadd.f32 1.0, %v191_v17  ;;  %v123_v21 = vmul.f32 %v121_v16, %v115_v18 }
 0x117   :  { %v124_v22 = vmul.f32 %v122_v20, %v116_v19 }
 0x119   :  { %v164_v23 = vpack.c.bf16 %v124_v22, %v123_v21 }
 0x11b   :  { %165 = vst [vmem:[#allocation7] sm:$0xff] %v164_v23  }
 0x11c   :  { %247 = shalt.err (!%p244_p6)
}
 0x11d   :  { %s248_s17 = scalar_lea.hbm %s341_s3, 128 }
 0x11e   :  { %p249_p7 = scmp.ne.s32.totalorder %s341_s3, %s248_s17  ;;  %p252_p8 = scmp.lt.u32.totalorder %s248_s17, %s341_s3 }
 0x120   :  { %p254_p9 = pnand %p252_p8, %p249_p7 }
 0x122   :  { %257 = shalt.err (!%p254_p9)
}
 0x123   :  { %146 = dma.vmem_to_hbm [thread:$0]  %s141_s14, 128, %s341_s3, [#allocation4], %s268_s0, %s268_s0, %s269_s9  }
 0x124   :  { %262 = dma.done.wait [#allocation4], 128  }
 0x125   :  { %263 = vsyncadd [#allocation4], 4294967168 }
 0x126   :  { %150 = vsyncpa [#allocation3], 1 }
 0x127   :  { %151 = vsyncpa [#allocation6], 1 }
 0x128   :  { %152 = vsyncpa [#allocation4], 1 }

</bundles_post_ra>
